<compile_context>
chip_gen: v5e
topology: v5e:2x2
jax: 0.10.0
libtpu: 0.0.40
codegen_flags: <defaults>
</compile_context>

<pallas_src>
import numpy as np
import jax
import jax.numpy as jnp
from jax.experimental import pallas as pl
from jax.experimental.pallas import tpu as pltpu


def _round_up(x, m):
    return (x + m - 1) // m * m


def _cdiv(a, b):
    return (a + b - 1) // b


def _is_small_int(x):
    return float(x) == int(x) and 1 <= int(x) <= 8


def _ipow(x, n):
    """x**n for a small positive Python int n via exponentiation-by-squaring (VPU muls only)."""
    n = int(n)
    result = None
    base = x
    while n > 0:
        if n & 1:
            result = base if result is None else result * base
        n >>= 1
        if n:
            base = base * base
    return result


def _make_dkd_tile_kernel(ab_alpha, ab_beta, temperature, B, C, TB):
    """Per-tile kernel: raw (un-scaled) TCKD / NCKD partial sums for TB batch rows."""
    inv_T = 1.0 / float(temperature)          # Python float (NOT a jnp constant)
    std_branch = (ab_alpha == 1 and ab_beta == 0)
    int_pow = (not std_branch) and _is_small_int(ab_alpha) and _is_small_int(ab_beta)
    TINY = 1e-30                               # guards log(0) / div-by-0 in degenerate tails

    if not std_branch:
        a = float(ab_alpha)
        b = float(ab_beta)
        c1 = 1.0 / (b * (a + b))
        c2 = 1.0 / (a * (a + b))
        c3 = -1.0 / (a * b)

    def kernel(tgt_ref, s_ref, t_ref, out_ref):
        i = pl.program_id(0)

        tgt = tgt_ref[...]                                 # (TB, 1) int32
        s = s_ref[...].astype(jnp.float32) * inv_T         # (TB, C)  bf16 -> f32 here
        t = t_ref[...].astype(jnp.float32) * inv_T

        cls = jax.lax.broadcasted_iota(jnp.int32, (TB, C), 1)
        gt = cls == tgt                                    # one-hot target mask

        # Valid-batch-row mask.  grid = cdiv(B, TB): the last tile may be ragged and its
        # out-of-range rows hold unspecified data.  Everything below is elementwise or a
        # per-row (axis=1) reduce, and the per-row results are SELECT-masked (NaN-safe)
        # before the cross-row reduction, so garbage rows contribute exactly zero.
        row = jax.lax.broadcasted_iota(jnp.int32, (TB, 1), 0) + i * TB
        row_ok = row < B

        # --- one softmax pass per tensor; gt / non-gt exp masses via masked reduces ---
        ms = jnp.max(s, axis=1, keepdims=True)
        es = jnp.exp(s - ms)
        es_gt = jnp.where(gt, es, 0.0)
        es_nt = es - es_gt                                 # exact: 0 on the target lane
        eg_s = jnp.sum(es_gt, axis=1, keepdims=True)       # target exp mass
        en_s = jnp.sum(es_nt, axis=1, keepdims=True)       # non-target exp mass
        zs = eg_s + en_s

        mt = jnp.max(t, axis=1, keepdims=True)
        et = jnp.exp(t - mt)
        et_gt = jnp.where(gt, et, 0.0)
        et_nt = et - et_gt
        eg_t = jnp.sum(et_gt, axis=1, keepdims=True)
        en_t = jnp.sum(et_nt, axis=1, keepdims=True)
        zt = eg_t + en_t

        # --- TCKD: binary (target vs rest) KL; all (TB, 1) row quantities ---
        inv_zs = 1.0 / zs
        inv_zt = 1.0 / zt
        ps1 = eg_s * inv_zs
        ps2 = en_s * inv_zs
        pt1 = eg_t * inv_zt
        pt2 = en_t * inv_zt
        log_ps1 = jnp.log(jnp.maximum(ps1, TINY))
        log_ps2 = jnp.log(jnp.maximum(ps2, TINY))
        log_pt1 = jnp.log(jnp.maximum(pt1, TINY))
        log_pt2 = jnp.log(jnp.maximum(pt2, TINY))
        tckd_row = pt1 * (log_pt1 - log_ps1) + pt2 * (log_pt2 - log_ps2)       # (TB, 1)
        tckd_p = jnp.sum(jnp.where(row_ok, tckd_row, 0.0), axis=0, keepdims=True)

        # Per-row constants of the non-target (C-1 class) distributions.
        log_en_s = jnp.log(jnp.maximum(en_s, TINY))
        log_en_t = jnp.log(jnp.maximum(en_t, TINY))
        inv_en_s = 1.0 / jnp.maximum(en_s, TINY)
        inv_en_t = 1.0 / jnp.maximum(en_t, TINY)

        if std_branch:
            # NCKD = KL(p_t_nt || p_s_nt) over the C-1 non-target classes.
            #   log p_t_nt - log p_s_nt = (t - s) - rowconst ;  p_t_nt = et_nt / en_t.
            # Target lane has et_nt == 0, so it contributes exactly 0 (no extra select).
            rowconst = (mt + log_en_t) - (ms + log_en_s)
            dlog = (t - s) - rowconst
            nckd_row = inv_en_t * jnp.sum(et_nt * dlog, axis=1, keepdims=True)  # (TB, 1)
        else:
            if int_pow:
                # Small-integer AB exponents: repeated multiplies, zero extra exp.
                # Target lane is already exactly 0 in r_t / r_s -> powers stay 0.
                r_t = et_nt * inv_en_t
                r_s = es_nt * inv_en_s
                apb = int(ab_alpha) + int(ab_beta)
                e1 = _ipow(r_t, apb)
                e2 = _ipow(r_s, apb)
                e3 = _ipow(r_t, int(ab_alpha)) * _ipow(r_s, int(ab_beta))
            else:
                # General exponents: p^e = exp(e * log p); target lane select-masked.
                lrt = (t - mt) - log_en_t
                lrs = (s - ms) - log_en_s
                e1 = jnp.where(gt, 0.0, jnp.exp((a + b) * lrt))
                e2 = jnp.where(gt, 0.0, jnp.exp((a + b) * lrs))
                e3 = jnp.where(gt, 0.0, jnp.exp(a * lrt + b * lrs))
            nckd_row = (c1 * jnp.sum(e1, axis=1, keepdims=True)
                        + c2 * jnp.sum(e2, axis=1, keepdims=True)
                        + c3 * jnp.sum(e3, axis=1, keepdims=True))
        nckd_p = jnp.sum(jnp.where(row_ok, nckd_row, 0.0), axis=0, keepdims=True)

        # Lane-dense (8, 128) partial-sum block: [0,0] = TCKD, [0,1] = NCKD, rest zero.
        r8 = jax.lax.broadcasted_iota(jnp.int32, (8, 128), 0)
        l8 = jax.lax.broadcasted_iota(jnp.int32, (8, 128), 1)
        out_ref[...] = jnp.where((r8 == 0) & (l8 == 0), tckd_p,
                                 jnp.where((r8 == 0) & (l8 == 1), nckd_p, 0.0))

    return kernel


def dkd_forward(logits_student, logits_teacher, target, epoch, *,
                alpha, beta, ab_alpha, ab_beta, temperature, warmup,
                cast_logits_to_bf16=False):
    assert logits_student.shape == logits_teacher.shape
    B, C = logits_student.shape

    if cast_logits_to_bf16:
        # Optional bandwidth/numerics tradeoff for HBM-bound v5e/v6e (off by default).
        logits_student = logits_student.astype(jnp.bfloat16)
        logits_teacher = logits_teacher.astype(jnp.bfloat16)

    # Generation-aware tile sizing: v7x has 64 MiB VMEM/core (smaller tiles, 32 MiB
    # scoped limit); v5e/v6e have 128 MiB (bigger tiles amortize per-step overhead).
    try:
        vmem_cap = pltpu.get_tpu_info().vmem_capacity_bytes
    except Exception:
        vmem_cap = 128 * 1024 * 1024
    if vmem_cap <= 64 * 1024 * 1024:
        max_tile_elems = 256 * 1024
        vmem_limit = 32 * 1024 * 1024
    else:
        max_tile_elems = 1024 * 1024
        vmem_limit = 64 * 1024 * 1024

    TB = max(8, min(1024, (max_tile_elems // max(C, 1)) // 8 * 8))
    TB = min(TB, _round_up(B, 8))
    if B > 8:
        # Guarantee n_tiles >= 2 so the "parallel" grid axis can shard across both v7x
        # TensorCores (negligible extra per-step cost on single-TC v5e/v6e).
        TB = min(TB, _round_up(_cdiv(B, 2), 8))
    n_tiles = _cdiv(B, TB)
    Bp = n_tiles * TB

    # Logits go in UNPADDED: block last dim == full class dim (legal for any C), and the
    # ragged last batch tile is masked in-kernel.  Only the tiny target vector is padded.
    tgt_p = jnp.pad(target.reshape(-1).astype(jnp.int32), (0, Bp - B)).reshape(Bp, 1)

    kernel = _make_dkd_tile_kernel(ab_alpha, ab_beta, temperature, B, C, TB)

    partials = pl.pallas_call(
        kernel,
        out_shape=jax.ShapeDtypeStruct((n_tiles * 8, 128), jnp.float32),
        grid=(n_tiles,),
        in_specs=[
            pl.BlockSpec((TB, 1), lambda i: (i, 0)),
            pl.BlockSpec((TB, C), lambda i: (i, 0)),
            pl.BlockSpec((TB, C), lambda i: (i, 0)),
        ],
        out_specs=pl.BlockSpec((8, 128), lambda i: (i, 0)),
        compiler_params=pltpu.CompilerParams(
            dimension_semantics=("parallel",),
            vmem_limit_bytes=vmem_limit,
        ),
    )(tgt_p, logits_student, logits_teacher)

    # Tiny final combine (kept outside the kernel so `epoch` never triggers a retrace).
    T = float(temperature)
    tckd = jnp.sum(partials[:, 0]) * (T * T) / float(B)
    nckd = jnp.sum(partials[:, 1]) * (T * T) / float(B)   # AB branch: mean over B == sum/B
    scale = min(float(epoch) / float(warmup), 1.0)
    return scale * (float(alpha) * tckd + float(beta) * nckd)


# ---------------- numpy reference (mirrors the torch code exactly) ----------------
def _dkd_ref(s, t, tgt, epoch, alpha, beta, ab_alpha, ab_beta, T, warmup):
    s = np.asarray(s, np.float32); t = np.asarray(t, np.float32)
    B, C = s.shape
    gt = np.zeros((B, C), dtype=bool)
    gt[np.arange(B), np.asarray(tgt)] = True

    def softmax(x):
        m = x.max(axis=1, keepdims=True)
        e = np.exp(x - m)
        return e / e.sum(axis=1, keepdims=True)

    ps = softmax(s / T); pt = softmax(t / T)
    ps_cat = np.stack([(ps * gt).sum(1), (ps * ~gt).sum(1)], axis=1)
    pt_cat = np.stack([(pt * gt).sum(1), (pt * ~gt).sum(1)], axis=1)
    tckd = float(np.sum(pt_cat * (np.log(pt_cat) - np.log(ps_cat))) * T * T / B)

    s_f = s[~gt].reshape(B, C - 1)
    t_f = t[~gt].reshape(B, C - 1)
    p_t = softmax(t_f / T); p_s = softmax(s_f / T)
    if ab_alpha == 1 and ab_beta == 0:
        x = s_f / T
        logp_s = x - x.max(1, keepdims=True)
        logp_s = logp_s - np.log(np.exp(logp_s).sum(1, keepdims=True))
        nckd = float(np.sum(p_t * (np.log(p_t) - logp_s)) * T * T / B)
    else:
        a, b = ab_alpha, ab_beta
        term1 = (p_t ** (a + b)).sum(1) / (b * (a + b))
        term2 = (p_s ** (a + b)).sum(1) / (a * (a + b))
        term3 = -(p_t ** a * p_s ** b).sum(1) / (a * b)
        nckd = float((term1 + term2 + term3).mean() * T * T)
    return min(epoch / warmup, 1.0) * (alpha * tckd + beta * nckd)


if __name__ == "__main__":
    ALPHA, BETA = 1.0, 8.0
    TEMPERATURE = 4.0
    WARMUP = 20
    EPOCH = 5

    key = jax.random.PRNGKey(0)
    k1, k2, k3, k4, k5, k6 = jax.random.split(key, 6)

    # --- small classification-head shape ---
    B, C = 8, 32
    ls = jax.random.normal(k1, (B, C), dtype=jnp.float32) * 2.0
    lt = jax.random.normal(k2, (B, C), dtype=jnp.float32) * 2.0
    tgt = jax.random.randint(k3, (B,), 0, C, dtype=jnp.int32)

    # Branch 1: AB-divergence NCKD with small-integer exponents (repeated-multiply path)
    out_ab = jax.block_until_ready(dkd_forward(
        ls, lt, tgt, EPOCH, alpha=ALPHA, beta=BETA, ab_alpha=2.0, ab_beta=1.0,
        temperature=TEMPERATURE, warmup=WARMUP))
    ref_ab = _dkd_ref(ls, lt, tgt, EPOCH, ALPHA, BETA, 2.0, 1.0, TEMPERATURE, WARMUP)
    np.testing.assert_allclose(np.asarray(out_ab), ref_ab, rtol=1e-4, atol=1e-4)

    # Branch 2: standard KL NCKD (ab_alpha == 1, ab_beta == 0)
    out_kl = jax.block_until_ready(dkd_forward(
        ls, lt, tgt, EPOCH, alpha=ALPHA, beta=BETA, ab_alpha=1, ab_beta=0,
        temperature=TEMPERATURE, warmup=WARMUP))
    ref_kl = _dkd_ref(ls, lt, tgt, EPOCH, ALPHA, BETA, 1, 0, TEMPERATURE, WARMUP)
    np.testing.assert_allclose(np.asarray(out_kl), ref_kl, rtol=1e-4, atol=1e-4)

    # Branch 3: non-integer AB exponents (exp fallback path)
    out_abf = jax.block_until_ready(dkd_forward(
        ls, lt, tgt, EPOCH, alpha=ALPHA, beta=BETA, ab_alpha=1.5, ab_beta=0.5,
        temperature=TEMPERATURE, warmup=WARMUP))
    ref_abf = _dkd_ref(ls, lt, tgt, EPOCH, ALPHA, BETA, 1.5, 0.5, TEMPERATURE, WARMUP)
    np.testing.assert_allclose(np.asarray(out_abf), ref_abf, rtol=1e-4, atol=1e-4)

    # Ragged batch + non-128 class count (exercises the no-pad / masked last tile path)
    B2, C2 = 13, 37
    ls2 = jax.random.normal(k4, (B2, C2), dtype=jnp.float32) * 2.0
    lt2 = jax.random.normal(k5, (B2, C2), dtype=jnp.float32) * 2.0
    tgt2 = jax.random.randint(k6, (B2,), 0, C2, dtype=jnp.int32)
    out_rg = jax.block_until_ready(dkd_forward(
        ls2, lt2, tgt2, EPOCH, alpha=ALPHA, beta=BETA, ab_alpha=1, ab_beta=0,
        temperature=TEMPERATURE, warmup=WARMUP))
    ref_rg = _dkd_ref(ls2, lt2, tgt2, EPOCH, ALPHA, BETA, 1, 0, TEMPERATURE, WARMUP)
    np.testing.assert_allclose(np.asarray(out_rg), ref_rg, rtol=1e-4, atol=1e-4)

    # bf16 logits accepted directly (half the HBM read traffic); loose accuracy check
    out_bf16 = jax.block_until_ready(dkd_forward(
        ls.astype(jnp.bfloat16), lt.astype(jnp.bfloat16), tgt, EPOCH,
        alpha=ALPHA, beta=BETA, ab_alpha=1, ab_beta=0,
        temperature=TEMPERATURE, warmup=WARMUP))
    assert np.isfinite(float(out_bf16))
    np.testing.assert_allclose(np.asarray(out_bf16), ref_kl, rtol=1e-1, atol=5e-2)

    print("KERNEL_OK")
</pallas_src>

<mosaic_0001>
module attributes {stable_mosaic.version = 11 : i64} {
  func.func @kernel(%arg0: i32, %arg1: memref<8x1xi32, #tpu.memory_space<vmem>>, %arg2: memref<8x32xf32, #tpu.memory_space<vmem>>, %arg3: memref<8x32xf32, #tpu.memory_space<vmem>>, %arg4: memref<8x128xf32, #tpu.memory_space<vmem>>) attributes {dimension_semantics = [#tpu.dimension_semantics<parallel>], iteration_bounds = array<i64: 1>, scalar_prefetch = 0 : i64, scratch_operands = 0 : i64, tpu.core_type = #tpu.core_type<tc>, window_params = [{transform_indices = @transform_0, window_bounds = array<i64: 8, 1>}, {transform_indices = @transform_1, window_bounds = array<i64: 8, 32>}, {transform_indices = @transform_2, window_bounds = array<i64: 8, 32>}, {transform_indices = @transform_3, window_bounds = array<i64: 8, 128>}]} {
    %c0 = arith.constant 0 : index
    %c0_0 = arith.constant 0 : index
    %0 = vector.load %arg1[%c0, %c0_0] : memref<8x1xi32, #tpu.memory_space<vmem>>, vector<8x1xi32>
    %c0_1 = arith.constant 0 : index
    %c0_2 = arith.constant 0 : index
    %1 = vector.load %arg2[%c0_1, %c0_2] : memref<8x32xf32, #tpu.memory_space<vmem>>, vector<8x32xf32>
    %cst = arith.constant 2.500000e-01 : f32
    %2 = vector.broadcast %cst : f32 to vector<8x32xf32>
    %3 = arith.mulf %1, %2 : vector<8x32xf32>
    %c0_3 = arith.constant 0 : index
    %c0_4 = arith.constant 0 : index
    %4 = vector.load %arg3[%c0_3, %c0_4] : memref<8x32xf32, #tpu.memory_space<vmem>>, vector<8x32xf32>
    %cst_5 = arith.constant 2.500000e-01 : f32
    %5 = vector.broadcast %cst_5 : f32 to vector<8x32xf32>
    %6 = arith.mulf %4, %5 : vector<8x32xf32>
    %7 = tpu.iota {dimensions = array<i32: 1>} : vector<8x32xi32>
    %8 = vector.broadcast %0 : vector<8x1xi32> to vector<8x32xi32>
    %9 = arith.cmpi eq, %7, %8 : vector<8x32xi32>
    %10 = tpu.iota {dimensions = array<i32: 0>} : vector<8x1xi32>
    %c8_i32 = arith.constant 8 : i32
    %11 = arith.muli %arg0, %c8_i32 : i32
    %12 = vector.broadcast %11 : i32 to vector<8x1xi32>
    %13 = arith.addi %10, %12 : vector<8x1xi32>
    %c8_i32_6 = arith.constant 8 : i32
    %14 = vector.broadcast %c8_i32_6 : i32 to vector<8x1xi32>
    %15 = arith.cmpi slt, %13, %14 : vector<8x1xi32>
    %cst_7 = arith.constant dense<0xFF800000> : vector<8xf32>
    %16 = vector.multi_reduction <maximumf>, %3, %cst_7 [1] : vector<8x32xf32> to vector<8xf32>
    %17 = vector.shape_cast %16 : vector<8xf32> to vector<8x1xf32>
    %18 = vector.broadcast %17 : vector<8x1xf32> to vector<8x32xf32>
    %19 = arith.subf %3, %18 : vector<8x32xf32>
    %20 = math.exp %19 : vector<8x32xf32>
    %cst_8 = arith.constant 0.000000e+00 : f32
    %21 = vector.broadcast %cst_8 : f32 to vector<8x32xf32>
    %22 = arith.select %9, %20, %21 : vector<8x32xi1>, vector<8x32xf32>
    %23 = arith.subf %20, %22 : vector<8x32xf32>
    %cst_9 = arith.constant dense<0.000000e+00> : vector<8xf32>
    %24 = vector.multi_reduction <add>, %22, %cst_9 [1] : vector<8x32xf32> to vector<8xf32>
    %25 = vector.shape_cast %24 : vector<8xf32> to vector<8x1xf32>
    %cst_10 = arith.constant dense<0.000000e+00> : vector<8xf32>
    %26 = vector.multi_reduction <add>, %23, %cst_10 [1] : vector<8x32xf32> to vector<8xf32>
    %27 = vector.shape_cast %26 : vector<8xf32> to vector<8x1xf32>
    %28 = arith.addf %25, %27 : vector<8x1xf32>
    %cst_11 = arith.constant dense<0xFF800000> : vector<8xf32>
    %29 = vector.multi_reduction <maximumf>, %6, %cst_11 [1] : vector<8x32xf32> to vector<8xf32>
    %30 = vector.shape_cast %29 : vector<8xf32> to vector<8x1xf32>
    %31 = vector.broadcast %30 : vector<8x1xf32> to vector<8x32xf32>
    %32 = arith.subf %6, %31 : vector<8x32xf32>
    %33 = math.exp %32 : vector<8x32xf32>
    %cst_12 = arith.constant 0.000000e+00 : f32
    %34 = vector.broadcast %cst_12 : f32 to vector<8x32xf32>
    %35 = arith.select %9, %33, %34 : vector<8x32xi1>, vector<8x32xf32>
    %36 = arith.subf %33, %35 : vector<8x32xf32>
    %cst_13 = arith.constant dense<0.000000e+00> : vector<8xf32>
    %37 = vector.multi_reduction <add>, %35, %cst_13 [1] : vector<8x32xf32> to vector<8xf32>
    %38 = vector.shape_cast %37 : vector<8xf32> to vector<8x1xf32>
    %cst_14 = arith.constant dense<0.000000e+00> : vector<8xf32>
    %39 = vector.multi_reduction <add>, %36, %cst_14 [1] : vector<8x32xf32> to vector<8xf32>
    %40 = vector.shape_cast %39 : vector<8xf32> to vector<8x1xf32>
    %41 = arith.addf %38, %40 : vector<8x1xf32>
    %cst_15 = arith.constant 1.000000e+00 : f32
    %42 = vector.broadcast %cst_15 : f32 to vector<8x1xf32>
    %43 = arith.divf %42, %28 : vector<8x1xf32>
    %cst_16 = arith.constant 1.000000e+00 : f32
    %44 = vector.broadcast %cst_16 : f32 to vector<8x1xf32>
    %45 = arith.divf %44, %41 : vector<8x1xf32>
    %46 = arith.mulf %25, %43 : vector<8x1xf32>
    %47 = arith.mulf %27, %43 : vector<8x1xf32>
    %48 = arith.mulf %38, %45 : vector<8x1xf32>
    %49 = arith.mulf %40, %45 : vector<8x1xf32>
    %cst_17 = arith.constant 1.000000e-30 : f32
    %50 = vector.broadcast %cst_17 : f32 to vector<8x1xf32>
    %51 = arith.maximumf %46, %50 : vector<8x1xf32>
    %52 = math.log %51 : vector<8x1xf32>
    %cst_18 = arith.constant 1.000000e-30 : f32
    %53 = vector.broadcast %cst_18 : f32 to vector<8x1xf32>
    %54 = arith.maximumf %47, %53 : vector<8x1xf32>
    %55 = math.log %54 : vector<8x1xf32>
    %cst_19 = arith.constant 1.000000e-30 : f32
    %56 = vector.broadcast %cst_19 : f32 to vector<8x1xf32>
    %57 = arith.maximumf %48, %56 : vector<8x1xf32>
    %58 = math.log %57 : vector<8x1xf32>
    %cst_20 = arith.constant 1.000000e-30 : f32
    %59 = vector.broadcast %cst_20 : f32 to vector<8x1xf32>
    %60 = arith.maximumf %49, %59 : vector<8x1xf32>
    %61 = math.log %60 : vector<8x1xf32>
    %62 = arith.subf %58, %52 : vector<8x1xf32>
    %63 = arith.mulf %48, %62 : vector<8x1xf32>
    %64 = arith.subf %61, %55 : vector<8x1xf32>
    %65 = arith.mulf %49, %64 : vector<8x1xf32>
    %66 = arith.addf %63, %65 : vector<8x1xf32>
    %cst_21 = arith.constant 0.000000e+00 : f32
    %67 = vector.broadcast %cst_21 : f32 to vector<8x1xf32>
    %68 = arith.select %15, %66, %67 : vector<8x1xi1>, vector<8x1xf32>
    %cst_22 = arith.constant dense<0.000000e+00> : vector<1xf32>
    %69 = vector.multi_reduction <add>, %68, %cst_22 [0] : vector<8x1xf32> to vector<1xf32>
    %70 = vector.shape_cast %69 : vector<1xf32> to vector<1x1xf32>
    %cst_23 = arith.constant 1.000000e-30 : f32
    %71 = vector.broadcast %cst_23 : f32 to vector<8x1xf32>
    %72 = arith.maximumf %27, %71 : vector<8x1xf32>
    %cst_24 = arith.constant 1.000000e+00 : f32
    %73 = vector.broadcast %cst_24 : f32 to vector<8x1xf32>
    %74 = arith.divf %73, %72 : vector<8x1xf32>
    %cst_25 = arith.constant 1.000000e-30 : f32
    %75 = vector.broadcast %cst_25 : f32 to vector<8x1xf32>
    %76 = arith.maximumf %40, %75 : vector<8x1xf32>
    %cst_26 = arith.constant 1.000000e+00 : f32
    %77 = vector.broadcast %cst_26 : f32 to vector<8x1xf32>
    %78 = arith.divf %77, %76 : vector<8x1xf32>
    %79 = vector.broadcast %78 : vector<8x1xf32> to vector<8x32xf32>
    %80 = arith.mulf %36, %79 : vector<8x32xf32>
    %81 = vector.broadcast %74 : vector<8x1xf32> to vector<8x32xf32>
    %82 = arith.mulf %23, %81 : vector<8x32xf32>
    %83 = arith.mulf %80, %80 : vector<8x32xf32>
    %84 = arith.mulf %80, %83 : vector<8x32xf32>
    %85 = arith.mulf %82, %82 : vector<8x32xf32>
    %86 = arith.mulf %82, %85 : vector<8x32xf32>
    %87 = arith.mulf %80, %80 : vector<8x32xf32>
    %88 = arith.mulf %87, %82 : vector<8x32xf32>
    %cst_27 = arith.constant dense<0.000000e+00> : vector<8xf32>
    %89 = vector.multi_reduction <add>, %84, %cst_27 [1] : vector<8x32xf32> to vector<8xf32>
    %90 = vector.shape_cast %89 : vector<8xf32> to vector<8x1xf32>
    %cst_28 = arith.constant 0.333333343 : f32
    %91 = vector.broadcast %cst_28 : f32 to vector<8x1xf32>
    %92 = arith.mulf %91, %90 : vector<8x1xf32>
    %cst_29 = arith.constant dense<0.000000e+00> : vector<8xf32>
    %93 = vector.multi_reduction <add>, %86, %cst_29 [1] : vector<8x32xf32> to vector<8xf32>
    %94 = vector.shape_cast %93 : vector<8xf32> to vector<8x1xf32>
    %cst_30 = arith.constant 0.166666672 : f32
    %95 = vector.broadcast %cst_30 : f32 to vector<8x1xf32>
    %96 = arith.mulf %95, %94 : vector<8x1xf32>
    %97 = arith.addf %92, %96 : vector<8x1xf32>
    %cst_31 = arith.constant dense<0.000000e+00> : vector<8xf32>
    %98 = vector.multi_reduction <add>, %88, %cst_31 [1] : vector<8x32xf32> to vector<8xf32>
    %99 = vector.shape_cast %98 : vector<8xf32> to vector<8x1xf32>
    %cst_32 = arith.constant -5.000000e-01 : f32
    %100 = vector.broadcast %cst_32 : f32 to vector<8x1xf32>
    %101 = arith.mulf %100, %99 : vector<8x1xf32>
    %102 = arith.addf %97, %101 : vector<8x1xf32>
    %cst_33 = arith.constant 0.000000e+00 : f32
    %103 = vector.broadcast %cst_33 : f32 to vector<8x1xf32>
    %104 = arith.select %15, %102, %103 : vector<8x1xi1>, vector<8x1xf32>
    %cst_34 = arith.constant dense<0.000000e+00> : vector<1xf32>
    %105 = vector.multi_reduction <add>, %104, %cst_34 [0] : vector<8x1xf32> to vector<1xf32>
    %106 = vector.shape_cast %105 : vector<1xf32> to vector<1x1xf32>
    %107 = tpu.iota {dimensions = array<i32: 0>} : vector<8x128xi32>
    %108 = tpu.iota {dimensions = array<i32: 1>} : vector<8x128xi32>
    %c0_i32 = arith.constant 0 : i32
    %109 = vector.broadcast %c0_i32 : i32 to vector<8x128xi32>
    %110 = arith.cmpi eq, %107, %109 : vector<8x128xi32>
    %c0_i32_35 = arith.constant 0 : i32
    %111 = vector.broadcast %c0_i32_35 : i32 to vector<8x128xi32>
    %112 = arith.cmpi eq, %108, %111 : vector<8x128xi32>
    %113 = arith.andi %110, %112 : vector<8x128xi1>
    %c0_i32_36 = arith.constant 0 : i32
    %114 = vector.broadcast %c0_i32_36 : i32 to vector<8x128xi32>
    %115 = arith.cmpi eq, %107, %114 : vector<8x128xi32>
    %c1_i32 = arith.constant 1 : i32
    %116 = vector.broadcast %c1_i32 : i32 to vector<8x128xi32>
    %117 = arith.cmpi eq, %108, %116 : vector<8x128xi32>
    %118 = arith.andi %115, %117 : vector<8x128xi1>
    %cst_37 = arith.constant 0.000000e+00 : f32
    %119 = vector.shape_cast %106 : vector<1x1xf32> to vector<1x1xf32>
    %120 = vector.broadcast %119 : vector<1x1xf32> to vector<8x128xf32>
    %121 = vector.broadcast %cst_37 : f32 to vector<8x128xf32>
    %122 = arith.select %118, %120, %121 : vector<8x128xi1>, vector<8x128xf32>
    %123 = vector.shape_cast %70 : vector<1x1xf32> to vector<1x1xf32>
    %124 = vector.broadcast %123 : vector<1x1xf32> to vector<8x128xf32>
    %125 = arith.select %113, %124, %122 : vector<8x128xi1>, vector<8x128xf32>
    %c0_38 = arith.constant 0 : index
    %c0_39 = arith.constant 0 : index
    %126 = vector.load %arg4[%c0_38, %c0_39] : memref<8x128xf32, #tpu.memory_space<vmem>>, vector<8x128xf32>
    tpu.vector_store %arg4[%c0_38, %c0_39], %125 {strides = array<i32>} : memref<8x128xf32, #tpu.memory_space<vmem>>, vector<8x128xf32>,
    return
  }
  func.func @transform_0(%arg0: i32) -> (i32, i32) {
    %c0_i32 = arith.constant 0 : i32
    %c0_i32_0 = arith.constant 0 : i32
    return %arg0, %c0_i32 : i32, i32
  }
  func.func @transform_1(%arg0: i32) -> (i32, i32) {
    %c0_i32 = arith.constant 0 : i32
    %c0_i32_0 = arith.constant 0 : i32
    return %arg0, %c0_i32 : i32, i32
  }
  func.func @transform_2(%arg0: i32) -> (i32, i32) {
    %c0_i32 = arith.constant 0 : i32
    %c0_i32_0 = arith.constant 0 : i32
    return %arg0, %c0_i32 : i32, i32
  }
  func.func @transform_3(%arg0: i32) -> (i32, i32) {
    %c0_i32 = arith.constant 0 : i32
    %c0_i32_0 = arith.constant 0 : i32
    return %arg0, %c0_i32 : i32, i32
  }
}

</mosaic_0001>

<bundles_post_ra>
// kernel: tpu_custom_call.1
= control target key start
LH: loop header
LB: loop body
LE: loop exit
PB: predicated region body
PF: predicated region fallthrough
CT: control target
= control target key end

     0   :  { %8 = vsyncpa [#allocation3], 0  ;;  %s366_s0 = inlined_call_operand.vmem [shape: s32[8,1], index: 0, kind: input, shape index: {}]   ;;  %s367_s1 = inlined_call_operand.vmem [shape: f32[8,32], index: 1, kind: input, shape index: {}]   ;;  %s368_s2 = inlined_call_operand.hbm [shape: f32[8,32], index: 2, kind: input, shape index: {}]   ;;  %s369_s3 = inlined_call_operand.hbm [shape: f32[8,128], index: 3, kind: output, shape index: {}]  }
   0x1   :  { %9 = vsyncpa [#allocation4], 0  ;;  %s19_s14 = sshll.u32 %s368_s2, 4  ;;  %s297_s15 = smov [#allocation2]   ;;  %s20_s14 = int_to_ptr.hbm [resolvable:$true] %s19_s14 }
   0x2   :  { %s21_s16 = sshll.u32 %s297_s15, 4  ;;  %s22_s16 = int_to_ptr.vmem [resolvable:$true] %s21_s16 }
   0x3   :  { %24 = dma.hbm_to_vmem [thread:$0]  %s20_s14, 128, %s22_s16, [#allocation3]  }
   0x4   :  { %293 = dma.done.wait [#allocation3], 128  }
   0x5   :  { %294 = vsyncadd [#allocation3], 4294967168  ;;  %v298_v0 = vmov 0   ;;  %v30_v1 = vld [vmem:[%s367_s1] sm:$0xff]  ;;  %vm46_vm0 = vcmask 261120   ;;  %v34_v10 = vlaneseq  ;;  %s210_s22 = sshll.u32 %s369_s3, 4  ;;  %s211_s22 = int_to_ptr.hbm [resolvable:$true] %s210_s22 }
   0x6   :  { %223 = vset.pattern.permute.xlu1 %v298_v0  ;;  %224 = vset.pattern.permute.xlu0 %v298_v0  ;;  %v29_v2 = vld [vmem:[%s366_s0] sm:$0xff]  ;;  %v31_v3 = vmul.f32 0.25, %v30_v1  ;;  %s299_s0 = smov [#allocation5]  }
   0x7   :  { %37 = vperm.xlu1 %223, %v29_v2   ;;  %v32_v4 = vld [vmem:[#allocation2] sm:$0xff]  ;;  %v332_v12 = vand.u32 127, %v34_v10  ;;  %s208_s1 = sshll.u32 %s299_s0, 4  ;;  %s209_s1 = int_to_ptr.vmem [resolvable:$true] %s208_s1 }
   0x8   :  { %v47_v5 = vsel %vm46_vm0, %v31_v3, -inf  ;;  %v33_v6 = vmul.f32 0.25, %v32_v4 }
   0x9   :  { %48 = vmax.xlane.f32.xlu0 %v47_v5 }
   0xa   :  { %v62_v7 = vsel %vm46_vm0, %v33_v6, -inf }
  0x11   :  { %63 = vmax.xlane.f32.xlu0 %v62_v7 }
  0x79   :  { %v38_v13 = vpop.permute.xlu1 %37 }
  0x7a   :  { %vm39_vm1 = vcmp.eq.s32.totalorder %v332_v12, %v38_v13 }
  0x7c   :  { %v49_v8 = vpop.xlane.xlu0 %48 }
  0x7d   :  { %v50_v9 = vsub.f32 %v31_v3, %v49_v8 }
  0x7f   :  { %v51_v11 = vmul.f32 1.442695, %v50_v9 }
  0x81   :  { %225 = vpow2.f32 %v51_v11 }
  0x84   :  { %v64_v14 = vpop.xlane.xlu0 %63 }
  0x85   :  { %v65_v15 = vsub.f32 %v33_v6, %v64_v14 }
  0x87   :  { %v226_v16 = vpop.eup %225  ;;  %v66_v17 = vmul.f32 1.442695, %v65_v15 }
  0x88   :  { %v53_v18 = vsel %vm39_vm1, %v226_v16, 0.0 }
  0x89   :  { %227 = vpow2.f32 %v66_v17  ;;  %v54_v19 = vsub.f32 %v226_v16, %v53_v18  ;;  %v55_v26 = vsel %vm46_vm0, %v53_v18, 0.0 }
  0x8b   :  { %v58_v20 = vsel %vm46_vm0, %v54_v19, 0.0 }
  0x8c   :  { %59 = vadd.xlane.f32.xlu1 %v58_v20 }
  0x8f   :  { %v228_v21 = vpop.eup %227 }
  0x90   :  { %v68_v22 = vsel %vm39_vm1, %v228_v21, 0.0 }
  0x91   :  { %v70_v23 = vsel %vm46_vm0, %v68_v22, 0.0  ;;  %v337_v24 = vsub.f32 %v228_v21, %v68_v22 }
  0x92   :  { %71 = vadd.xlane.f32.xlu0 %v70_v23 }
  0x93   :  { %v73_v25 = vsel %vm46_vm0, %v337_v24, 0.0 }
  0x94   :  { %74 = vadd.xlane.f32.xlu2 %v73_v25 }
  0x9c   :  { %56 = vadd.xlane.f32.xlu2 %v55_v26 }
  0xff   :  { %v342_v27 = vpop.xlane.xlu1 %59 }
 0x100   :  { %v135_v28 = vmax.f32 %v342_v27, 1e-30 }
 0x102   :  { %229 = vrcp.f32 %v135_v28  ;;  %v147_v37 = vand.u32 2147483648, %v135_v28  ;;  %v145_v38 = vand.u32 2147483647, %v135_v28  ;;  %vm141_vm3 = vweird.f32 %v135_v28 }
 0x104   :  { %v148_v46 = vor.u32 1.1754944e-38, %v147_v37  ;;  %vm146_vm5 = vcmp.eq.f32.partialorder %v145_v38, 8.507059e+37 }
 0x105   :  { %v72_v29 = vpop.xlane.xlu0 %71 }
 0x107   :  { %v345_v30 = vpop.xlane.xlu2 %74 }
 0x108   :  { %v230_v31 = vpop.eup %229  ;;  %v76_v32 = vadd.f32 %v345_v30, %v72_v29  ;;  %v151_v33 = vmax.f32 %v345_v30, 1e-30 }
 0x109   :  { %v137_v34 = vmul.f32 %v230_v31, %v135_v28  ;;  %vm142_vm2 = vweird.f32 %v230_v31 }
 0x10a   :  { %231 = vrcp.f32 %v76_v32  ;;  %vm143_vm4 = vmor %vm141_vm3, %vm142_vm2  ;;  %v103_v50 = vand.u32 2147483648, %v76_v32  ;;  %v101_v54 = vand.u32 2147483647, %v76_v32  ;;  %v163_v55 = vand.u32 2147483648, %v151_v33 }
 0x10b   :  { %v138_v35 = vsub.f32 1.0, %v137_v34  ;;  %233 = vrcp.f32 %v151_v33  ;;  %v161_v58 = vand.u32 2147483647, %v151_v33  ;;  %vm97_vm8 = vweird.f32 %v76_v32 }
 0x10c   :  { %v104_v61 = vor.u32 1.1754944e-38, %v103_v50  ;;  %vm157_vm10 = vweird.f32 %v151_v33  ;;  %vm102_vm11 = vcmp.eq.f32.partialorder %v101_v54, 8.507059e+37  ;;  %v164_v2 = vor.u32 1.1754944e-38, %v163_v55 }
 0x10d   :  { %v139_v36 = vmul.f32 %v230_v31, %v138_v35  ;;  %vm162_vm13 = vcmp.eq.f32.partialorder %v161_v58, 8.507059e+37  ;;  %vm198_vm3 = vcmp.eq.s32.totalorder %v332_v12, 1 }
 0x10f   :  { %v349_v39 = vpop.xlane.xlu2 %56  ;;  %v140_v40 = vadd.f32 %v230_v31, %v139_v36 }
 0x110   :  { %v232_v41 = vpop.eup %231  ;;  %v61_v42 = vadd.f32 %v342_v27, %v349_v39 }
 0x111   :  { %v234_v43 = vpop.eup %233  ;;  %v93_v44 = vmul.f32 %v232_v41, %v76_v32  ;;  %v144_v45 = vsel %vm143_vm4, %v230_v31, %v140_v40  ;;  %vm98_vm6 = vweird.f32 %v232_v41  ;;  %vm196_vm4 = vcmp.eq.s32.totalorder %v332_v12, 0 }
 0x112   :  { %v153_v47 = vmul.f32 %v234_v43, %v151_v33  ;;  %235 = vrcp.f32 %v61_v42  ;;  %v149_v49 = vsel %vm146_vm5, %v148_v46, %v144_v45  ;;  %vm158_vm7 = vweird.f32 %v234_v43  ;;  %vm99_vm9 = vmor %vm97_vm8, %vm98_vm6 }
 0x113   :  { %v94_v48 = vsub.f32 1.0, %v93_v44  ;;  %v168_v51 = vmul.f32 %v149_v49, %v54_v19  ;;  %vm159_vm12 = vmor %vm157_vm10, %vm158_vm7  ;;  %v88_v8 = vand.u32 2147483648, %v61_v42  ;;  %v86_v14 = vand.u32 2147483647, %v61_v42 }
 0x114   :  { %v154_v52 = vsub.f32 1.0, %v153_v47  ;;  %vm82_vm15 = vweird.f32 %v61_v42 }
 0x115   :  { %v95_v53 = vmul.f32 %v232_v41, %v94_v48  ;;  %v171_v56 = vmul.f32 %v168_v51, %v168_v51  ;;  %v89_v18 = vor.u32 1.1754944e-38, %v88_v8  ;;  %vm87_vm2 = vcmp.eq.f32.partialorder %v86_v14, 8.507059e+37 }
 0x116   :  { %v155_v57 = vmul.f32 %v234_v43, %v154_v52 }
 0x117   :  { %v96_v59 = vadd.f32 %v232_v41, %v95_v53  ;;  %v172_v62 = vmul.f32 %v171_v56, %v168_v51 }
 0x118   :  { %v236_v60 = vpop.eup %235  ;;  %v156_v63 = vadd.f32 %v234_v43, %v155_v57  ;;  %v41_v57 = vshrl.u32 %v34_v10, 7 }
 0x119   :  { %v100_v0 = vsel %vm99_vm9, %v232_v41, %v96_v59  ;;  %v78_v1 = vmul.f32 %v236_v60, %v61_v42  ;;  %v178_v4 = vsel %vm46_vm0, %v172_v62, 0.0  ;;  %vm83_vm14 = vweird.f32 %v236_v60 }
 0x11a   :  { %v105_v3 = vsel %vm102_vm11, %v104_v61, %v100_v0  ;;  %v160_v5 = vsel %vm159_vm12, %v234_v43, %v156_v63  ;;  %179 = vadd.xlane.f32.xlu0 %v178_v4  ;;  %vm84_vm1 = vmor %vm82_vm15, %vm83_vm14 }
 0x11b   :  { %v79_v6 = vsub.f32 1.0, %v78_v1  ;;  %v165_v7 = vsel %vm162_vm13, %v164_v2, %v160_v5  ;;  %v109_v11 = vmul.f32 %v105_v3, %v72_v29  ;;  %v110_v15 = vmul.f32 %v105_v3, %v345_v30 }
 0x11c   :  { %v167_v9 = vmul.f32 %v165_v7, %v337_v24 }
 0x11d   :  { %v80_v13 = vmul.f32 %v236_v60, %v79_v6  ;;  %v117_v20 = vmax.f32 %v109_v11, 1e-30  ;;  %v120_v22 = vmax.f32 %v110_v15, 1e-30 }
 0x11e   :  { %v169_v16 = vmul.f32 %v167_v9, %v167_v9 }
 0x11f   :  { %v81_v17 = vadd.f32 %v236_v60, %v80_v13  ;;  %237 = vlog2.f32 %v117_v20 }
 0x120   :  { %v170_v19 = vmul.f32 %v169_v16, %v167_v9  ;;  %239 = vlog2.f32 %v120_v22  ;;  %v173_v30 = vmul.f32 %v169_v16, %v168_v51 }
 0x121   :  { %v85_v21 = vsel %vm84_vm1, %v236_v60, %v81_v17 }
 0x122   :  { %v90_v23 = vsel %vm87_vm2, %v89_v18, %v85_v21  ;;  %v174_v25 = vsel %vm46_vm0, %v170_v19, 0.0  ;;  %v183_v31 = vsel %vm46_vm0, %v173_v30, 0.0  ;;  %vm195_vm0 = vcmp.eq.s32.totalorder %v41_v57, 0 }
 0x123   :  { %v107_v24 = vmul.f32 %v90_v23, %v349_v39  ;;  %v108_v26 = vmul.f32 %v90_v23, %v342_v27  ;;  %175 = vadd.xlane.f32.xlu2 %v174_v25  ;;  %vm199_vm5 = vmand %vm195_vm0, %vm198_vm3 }
 0x124   :  { %vm197_vm6 = vmand %vm195_vm0, %vm196_vm4 }
 0x125   :  { %v111_v28 = vmax.f32 %v107_v24, 1e-30  ;;  %v114_v29 = vmax.f32 %v108_v26, 1e-30  ;;  %v238_v32 = vpop.eup %237 }
 0x126   :  { %v240_v33 = vpop.eup %239  ;;  %v119_v36 = vmul.f32 0.6931472, %v238_v32 }
 0x127   :  { %241 = vlog2.f32 %v111_v28  ;;  %v122_v38 = vmul.f32 0.6931472, %v240_v33 }
 0x128   :  { %243 = vlog2.f32 %v114_v29 }
 0x12b   :  { %184 = vadd.xlane.f32.xlu2 %v183_v31 }
 0x12d   :  { %v242_v34 = vpop.eup %241 }
 0x12e   :  { %v244_v35 = vpop.eup %243  ;;  %v113_v37 = vmul.f32 0.6931472, %v242_v34 }
 0x12f   :  { %v116_v39 = vmul.f32 0.6931472, %v244_v35 }
 0x130   :  { %v123_v27 = vsub.f32 %v119_v36, %v113_v37 }
 0x131   :  { %v125_v40 = vsub.f32 %v122_v38, %v116_v39 }
 0x132   :  { %v124_v41 = vmul.f32 %v123_v27, %v109_v11 }
 0x133   :  { %v126_v42 = vmul.f32 %v125_v40, %v110_v15 }
 0x135   :  { %v127_v43 = vadd.f32 %v126_v42, %v124_v41 }
 0x137   :  { %v129_v45 = vrot.slane %v127_v43, 4 }
 0x139   :  { %v130_v49 = vadd.f32 %v129_v45, %v127_v43 }
 0x13b   :  { %v131_v54 = vrot.slane %v130_v49, 2 }
 0x13d   :  { %v132_v58 = vadd.f32 %v131_v54, %v130_v49 }
 0x13f   :  { %v133_v61 = vrot.slane %v132_v58, 1 }
 0x141   :  { %v134_v10 = vadd.f32 %v133_v61, %v132_v58 }
 0x18d   :  { %v180_v46 = vpop.xlane.xlu0 %179 }
 0x18e   :  { %v181_v48 = vmul.f32 0.16666667, %v180_v46 }
 0x196   :  { %v176_v44 = vpop.xlane.xlu2 %175 }
 0x197   :  { %v177_v47 = vmul.f32 0.33333334, %v176_v44 }
 0x199   :  { %v182_v51 = vadd.f32 %v181_v48, %v177_v47 }
 0x19e   :  { %v185_v50 = vpop.xlane.xlu2 %184 }
 0x19f   :  { %v186_v52 = vmul.f32 -0.5, %v185_v50 }
 0x1a1   :  { %v187_v53 = vadd.f32 %v186_v52, %v182_v51 }
 0x1a3   :  { %v189_v55 = vrot.slane %v187_v53, 4 }
 0x1a5   :  { %v190_v56 = vadd.f32 %v189_v55, %v187_v53 }
 0x1a7   :  { %v191_v59 = vrot.slane %v190_v56, 2 }
 0x1a9   :  { %v192_v60 = vadd.f32 %v191_v59, %v190_v56 }
 0x1ab   :  { %v193_v62 = vrot.slane %v192_v60, 1 }
 0x1ad   :  { %v194_v63 = vadd.f32 %v193_v62, %v192_v60 }
 0x1af   :  { %v200_v0 = vsel %vm199_vm5, %v194_v63, 0.0 }
 0x1b0   :  { %v201_v1 = vsel %vm197_vm6, %v134_v10, %v200_v0 }
 0x1b1   :  { %202 = vst [vmem:[#allocation5] sm:$0xff] %v201_v1 }
 0x1b2   :  { %213 = dma.vmem_to_hbm [thread:$0]  %s209_s1, 128, %s211_s22, [#allocation4]  }
 0x1b3   :  { %295 = dma.done.wait [#allocation4], 128  }
 0x1b4   :  { %296 = vsyncadd [#allocation4], 4294967168 }
 0x1b5   :  { %218 = vsyncpa [#allocation3], 1 }
 0x1b6   :  { %219 = vsyncpa [#allocation4], 1 }

</bundles_post_ra>
